<compile_context>
chip_gen: v7x
topology: tpu7x:2x2x1
jax: 0.10.0
libtpu: 0.0.40
codegen_flags: <defaults>
</compile_context>

<pallas_src>
import functools

import jax
import jax.numpy as jnp
from jax.experimental import pallas as pl
from jax.experimental.pallas import tpu as pltpu

_SUBLANE = 16   # sublane granule (bf16 packs 16 rows / vreg; also fine for f32)
_LANE = 128     # lane granule


def _round_up(x, m):
    return ((x + m - 1) // m) * m


def _apply_act(h, act_fun):
    act_fun = act_fun.lower()
    if act_fun == "relu":
        return jnp.maximum(h, 0.0)
    if act_fun == "tanh":
        return jnp.tanh(h)
    if act_fun == "gelu":
        # PyTorch F.gelu default is the exact erf form.
        return jax.nn.gelu(h, approximate=False)
    if act_fun == "sigmoid":
        return jax.nn.sigmoid(h)
    if act_fun == "sin":
        return jnp.sin(2.0 * jnp.pi * h)
    raise ValueError(f"unsupported act_fun: {act_fun}")


def _mlp_kernel(x_ref, w1_ref, b1_ref, w2_ref, b2_ref, o_ref, acc_ref, *, act_fun):
    """One (block_m, Cin) x-tile against one Cmid-tile of the weights."""
    k = pl.program_id(1)

    @pl.when(k == 0)
    def _init():
        acc_ref[...] = jnp.zeros_like(acc_ref)

    # First linear: cast x to the MXU compute dtype here (instead of a separate
    # wrapper-side HBM pass); accumulate in f32.
    h = jnp.dot(x_ref[...].astype(w1_ref.dtype), w1_ref[...],
                preferred_element_type=jnp.float32)
    h = h + b1_ref[...]
    h = _apply_act(h, act_fun)   # f32 activation (exact on all generations)

    # Second linear, accumulated over Cmid tiles (num_k == 1 when weights are
    # fully resident).
    acc_ref[...] += jnp.dot(h.astype(w2_ref.dtype), w2_ref[...],
                            preferred_element_type=jnp.float32)

    @pl.when(k == pl.num_programs(1) - 1)
    def _finalize():
        o_ref[...] = (acc_ref[...] + b2_ref[...]).astype(o_ref.dtype)


def _block_spec(shape, index_map, *, single_buffer=False):
    """BlockSpec, optionally single-buffered (for constant-index resident operands)."""
    if single_buffer:
        buffered = getattr(pl, "Buffered", None)
        if buffered is not None:
            try:
                return pl.BlockSpec(shape, index_map, pipeline_mode=buffered(1))
            except TypeError:
                pass  # older BlockSpec signature: fall back to default buffering
    return pl.BlockSpec(shape, index_map)


def _vmem_budget_bytes():
    cap = None
    try:
        cap = getattr(pltpu.get_tpu_info(), "vmem_capacity_bytes", None)
    except Exception:
        cap = None
    if not cap:
        cap = 64 * 2**20          # conservative (v7x-sized) fallback
    return int(cap * 0.85)        # headroom for compiler temporaries


def _pad_to(a, shape):
    if tuple(a.shape) == tuple(shape):
        return a
    pads = [(0, t - s) for s, t in zip(a.shape, shape)]
    return jnp.pad(a, pads)


@functools.partial(jax.jit,
                   static_argnames=("act_fun", "block_m", "k_tile", "compute_dtype"))
def mlp_pallas(x, w1, b1, w2, b2, *, act_fun="relu", block_m=None, k_tile=None,
               compute_dtype=jnp.bfloat16):
    """Fused MLP: act(x @ w1 + b1) @ w2 + b2.

    x: (..., Cin); w1: (Cin, Cmid); b1: (Cmid,); w2: (Cmid, Cout); b2: (Cout,).
    Policy: MXU operands are cast to `compute_dtype` (bf16 default) with f32
    accumulation; pass compute_dtype=jnp.float32 for an exact path.
    """
    orig_shape = x.shape
    Cin = orig_shape[-1]
    Cmid = w1.shape[1]
    Cout = w2.shape[1]
    out_dtype = x.dtype

    x2 = x.reshape(-1, Cin)
    B = x2.shape[0]

    x_bpe = jnp.dtype(x.dtype).itemsize
    c_bpe = jnp.dtype(compute_dtype).itemsize
    o_bpe = jnp.dtype(out_dtype).itemsize

    vmem_budget = _vmem_budget_bytes()

    # ---- Cmid tiling: weights resident (single-buffered) when they fit,
    # otherwise stream Cmid tiles along a reduction grid axis (v7x-safe path).
    resident_w_bytes = (Cin * Cmid + Cmid * Cout) * c_bpe + (Cmid + Cout) * 4
    if k_tile is None and resident_w_bytes <= vmem_budget // 2:
        tk, Cmid_p, num_k = Cmid, Cmid, 1
        weights_foot = resident_w_bytes                         # single-buffered
    else:
        if k_tile is not None:
            tk = _round_up(int(k_tile), _LANE)
        else:
            per_col = 2 * (Cin + Cout) * c_bpe + 8              # double-buffered tiles
            tk = max(_LANE, ((vmem_budget // 2) // per_col) // _LANE * _LANE)
        tk = min(tk, _round_up(Cmid, _LANE))
        Cmid_p = _round_up(Cmid, tk)
        num_k = Cmid_p // tk
        weights_foot = 2 * ((Cin + Cout) * tk * c_bpe + tk * 4) + Cout * 4

    # ---- batch tile: biggest of {1024,512,256,128} with >=4 grid steps
    # (>= 2 per TensorCore on v7x) that fits the remaining VMEM.
    per_row = (2 * Cin * x_bpe            # double-buffered x tile
               + 2 * Cout * o_bpe         # double-buffered out tile
               + Cout * 4                 # f32 accumulator scratch
               + tk * (4 + c_bpe))        # f32 h slab + compute-dtype copy
    avail = max(vmem_budget - weights_foot, 4 * 2**20)
    if block_m is None:
        block_m = 0
        for bm in (1024, 512, 256, 128):
            if B >= 4 * bm and bm * per_row <= int(0.8 * avail):
                block_m = bm
                break
        if block_m == 0:   # small B: one (or few) tile(s)
            block_m = min(512, _round_up(B, _SUBLANE))
            while block_m > _SUBLANE and block_m * per_row > int(0.8 * avail):
                block_m = _round_up(block_m // 2, _SUBLANE)
    block_m = max(_SUBLANE, _round_up(int(block_m), _SUBLANE))
    B_p = _round_up(B, block_m)
    grid = (B_p // block_m, num_k)

    # ---- operand prep: pad only where needed (batch tail; Cmid when streaming).
    x_p = _pad_to(x2, (B_p, Cin))
    w1_p = _pad_to(w1.astype(compute_dtype), (Cin, Cmid_p))
    w2_p = _pad_to(w2.astype(compute_dtype), (Cmid_p, Cout))
    b1_p = _pad_to(b1.astype(jnp.float32).reshape(1, Cmid), (1, Cmid_p))
    b2_p = b2.astype(jnp.float32).reshape(1, Cout)

    # ---- VMEM limit: sized from the footprint, clamped per generation.
    est = weights_foot + block_m * per_row + 2 * 2**20
    vmem_limit = int(min(vmem_budget, max(32 * 2**20, 2 * est)))

    # ---- advisory cost hint (roofline documentation for XLA scheduling).
    flops = 2 * B_p * (Cin * Cmid_p + Cmid_p * Cout)
    transcendentals = (B_p * Cmid_p
                       if act_fun.lower() in ("tanh", "gelu", "sigmoid", "sin")
                       else 0)
    bytes_accessed = (B_p * Cin * x_bpe
                      + (Cin * Cmid_p + Cmid_p * Cout) * c_bpe
                      + (Cmid_p + Cout) * 4
                      + B_p * Cout * o_bpe)
    cost = pl.CostEstimate(flops=flops, transcendentals=transcendentals,
                           bytes_accessed=bytes_accessed)

    resident = (num_k == 1)
    in_specs = [
        pl.BlockSpec((block_m, Cin), lambda i, k: (i, 0)),                     # x tile
        _block_spec((Cin, tk), lambda i, k: (0, k), single_buffer=resident),   # W1
        _block_spec((1, tk), lambda i, k: (0, k), single_buffer=resident),     # b1
        _block_spec((tk, Cout), lambda i, k: (k, 0), single_buffer=resident),  # W2
        _block_spec((1, Cout), lambda i, k: (0, 0), single_buffer=True),       # b2
    ]
    out_spec = pl.BlockSpec((block_m, Cout), lambda i, k: (i, 0))

    out_p = pl.pallas_call(
        functools.partial(_mlp_kernel, act_fun=act_fun),
        out_shape=jax.ShapeDtypeStruct((B_p, Cout), out_dtype),
        grid_spec=pltpu.PrefetchScalarGridSpec(
            num_scalar_prefetch=0,
            grid=grid,
            in_specs=in_specs,
            out_specs=out_spec,
            scratch_shapes=[pltpu.VMEM((block_m, Cout), jnp.float32)],
        ),
        compiler_params=pltpu.CompilerParams(
            dimension_semantics=("parallel", "arbitrary"),
            vmem_limit_bytes=vmem_limit),
        cost_estimate=cost,
    )(x_p, w1_p, b1_p, w2_p, b2_p)

    out = out_p[:B] if B_p != B else out_p
    return out.reshape(orig_shape[:-1] + (Cout,))


def mlp_reference(x, w1, b1, w2, b2, act_fun="relu"):
    h = _apply_act(x @ w1 + b1, act_fun)
    return h @ w2 + b2


if __name__ == "__main__":
    key = jax.random.PRNGKey(0)

    # --- Test 1: resident-weight path.  Linear(16->32) -> ReLU -> Linear(32->16).
    B, Cin, Cmid, Cout = 512, 16, 32, 16
    kx, k1, kb1, k2, kb2, knext = jax.random.split(key, 6)
    x = jax.random.normal(kx, (B, Cin), dtype=jnp.float32)
    w1 = jax.random.normal(k1, (Cin, Cmid), dtype=jnp.float32) * 0.1
    b1 = jax.random.normal(kb1, (Cmid,), dtype=jnp.float32) * 0.1
    w2 = jax.random.normal(k2, (Cmid, Cout), dtype=jnp.float32) * 0.1
    b2 = jax.random.normal(kb2, (Cout,), dtype=jnp.float32) * 0.1

    ref = mlp_reference(x, w1, b1, w2, b2, act_fun="relu")

    out_f32 = jax.block_until_ready(
        mlp_pallas(x, w1, b1, w2, b2, act_fun="relu", compute_dtype=jnp.float32))
    assert out_f32.shape == (B, Cout)
    assert jnp.allclose(out_f32, ref, atol=2e-2, rtol=2e-2), "f32 path mismatch"

    out_bf16 = jax.block_until_ready(
        mlp_pallas(x, w1, b1, w2, b2, act_fun="relu"))   # bf16 MXU, f32 accumulation
    assert out_bf16.shape == (B, Cout)
    assert jnp.allclose(out_bf16, ref, atol=6e-2, rtol=6e-2), "bf16 path mismatch"

    # --- Test 2: Cmid-streaming path (k_tile forces 2 reduction steps), exact-erf
    # gelu, and a non-divisible batch (exercises batch-tail padding).
    B2, Cin2, Cmid2, Cout2 = 200, 64, 256, 48
    xa, wa, ba, wb, bb = jax.random.split(knext, 5)
    x_s = jax.random.normal(xa, (B2, Cin2), dtype=jnp.float32)
    w1_s = jax.random.normal(wa, (Cin2, Cmid2), dtype=jnp.float32) * 0.05
    b1_s = jax.random.normal(ba, (Cmid2,), dtype=jnp.float32) * 0.05
    w2_s = jax.random.normal(wb, (Cmid2, Cout2), dtype=jnp.float32) * 0.05
    b2_s = jax.random.normal(bb, (Cout2,), dtype=jnp.float32) * 0.05

    ref2 = mlp_reference(x_s, w1_s, b1_s, w2_s, b2_s, act_fun="gelu")
    out2 = jax.block_until_ready(
        mlp_pallas(x_s, w1_s, b1_s, w2_s, b2_s, act_fun="gelu",
                   compute_dtype=jnp.float32, k_tile=128))
    assert out2.shape == (B2, Cout2)
    assert jnp.allclose(out2, ref2, atol=2e-2, rtol=2e-2), "streaming path mismatch"

    print("KERNEL_OK")
</pallas_src>

<mosaic_0001>
module attributes {stable_mosaic.version = 11 : i64} {
  func.func @_mlp_kernel(%arg0: i32, %arg1: i32, %arg2: memref<128x16xf32, #tpu.memory_space<vmem>>, %arg3: memref<16x32xf32, #tpu.memory_space<vmem>>, %arg4: memref<1x32xf32, #tpu.memory_space<vmem>>, %arg5: memref<32x16xf32, #tpu.memory_space<vmem>>, %arg6: memref<1x16xf32, #tpu.memory_space<vmem>>, %arg7: memref<128x16xf32, #tpu.memory_space<vmem>>, %arg8: memref<128x16xf32, #tpu.memory_space<vmem>>) attributes {dimension_semantics = [#tpu.dimension_semantics<parallel>, #tpu.dimension_semantics<arbitrary>], iteration_bounds = array<i64: 4, 1>, scalar_prefetch = 0 : i64, scratch_operands = 1 : i64, tpu.core_type = #tpu.core_type<tc>, window_params = [{transform_indices = @transform_0, window_bounds = array<i64: 128, 16>}, {pipeline_mode = #tpu.pipeline_mode<synchronous>, transform_indices = @transform_1, window_bounds = array<i64: 16, 32>}, {pipeline_mode = #tpu.pipeline_mode<synchronous>, transform_indices = @transform_2, window_bounds = array<i64: 1, 32>}, {pipeline_mode = #tpu.pipeline_mode<synchronous>, transform_indices = @transform_3, window_bounds = array<i64: 32, 16>}, {pipeline_mode = #tpu.pipeline_mode<synchronous>, transform_indices = @transform_4, window_bounds = array<i64: 1, 16>}, {transform_indices = @transform_5, window_bounds = array<i64: 128, 16>}]} {
    %c0_i32 = arith.constant 0 : i32
    %0 = arith.cmpi eq, %arg1, %c0_i32 : i32
    %1 = arith.extui %0 : i1 to i32
    %c0_i32_0 = arith.constant 0 : i32
    %2 = arith.cmpi ne, %1, %c0_i32_0 : i32
    scf.if %2 {
      %cst_16 = arith.constant 0.000000e+00 : f32
      %19 = vector.broadcast %cst_16 : f32 to vector<128x16xf32>
      %c0_17 = arith.constant 0 : index
      %c0_18 = arith.constant 0 : index
      %20 = vector.load %arg8[%c0_17, %c0_18] : memref<128x16xf32, #tpu.memory_space<vmem>>, vector<128x16xf32>
      tpu.vector_store %arg8[%c0_17, %c0_18], %19 {strides = array<i32>} : memref<128x16xf32, #tpu.memory_space<vmem>>, vector<128x16xf32>,
    } else {
    }
    %c0 = arith.constant 0 : index
    %c0_1 = arith.constant 0 : index
    %3 = vector.load %arg2[%c0, %c0_1] : memref<128x16xf32, #tpu.memory_space<vmem>>, vector<128x16xf32>
    %c0_2 = arith.constant 0 : index
    %c0_3 = arith.constant 0 : index
    %4 = vector.load %arg3[%c0_2, %c0_3] : memref<16x32xf32, #tpu.memory_space<vmem>>, vector<16x32xf32>
    %cst = arith.constant dense<0.000000e+00> : vector<128x32xf32>
    %5 = tpu.matmul %3, %4, %cst {dimension_numbers = #tpu.dot_dimension_numbers<[1], [0], [0], [1], [0, 0, 1, 1], [], []>} : vector<128x16xf32>, vector<16x32xf32>, vector<128x32xf32> -> vector<128x32xf32>
    %c0_4 = arith.constant 0 : index
    %c0_5 = arith.constant 0 : index
    %6 = vector.load %arg4[%c0_4, %c0_5] : memref<1x32xf32, #tpu.memory_space<vmem>>, vector<1x32xf32>
    %7 = vector.broadcast %6 : vector<1x32xf32> to vector<128x32xf32>
    %8 = arith.addf %5, %7 : vector<128x32xf32>
    %cst_6 = arith.constant 0.000000e+00 : f32
    %9 = vector.broadcast %cst_6 : f32 to vector<128x32xf32>
    %10 = arith.maximumf %8, %9 : vector<128x32xf32>
    %c0_7 = arith.constant 0 : index
    %c0_8 = arith.constant 0 : index
    %11 = vector.load %arg8[%c0_7, %c0_8] : memref<128x16xf32, #tpu.memory_space<vmem>>, vector<128x16xf32>
    %c0_9 = arith.constant 0 : index
    %c0_10 = arith.constant 0 : index
    %12 = vector.load %arg5[%c0_9, %c0_10] : memref<32x16xf32, #tpu.memory_space<vmem>>, vector<32x16xf32>
    %cst_11 = arith.constant dense<0.000000e+00> : vector<128x16xf32>
    %13 = tpu.matmul %10, %12, %cst_11 {dimension_numbers = #tpu.dot_dimension_numbers<[1], [0], [0], [1], [0, 0, 1, 1], [], []>} : vector<128x32xf32>, vector<32x16xf32>, vector<128x16xf32> -> vector<128x16xf32>
    %14 = arith.addf %11, %13 : vector<128x16xf32>
    %c0_12 = arith.constant 0 : index
    %c0_13 = arith.constant 0 : index
    %15 = vector.load %arg8[%c0_12, %c0_13] : memref<128x16xf32, #tpu.memory_space<vmem>>, vector<128x16xf32>
    tpu.vector_store %arg8[%c0_12, %c0_13], %14 {strides = array<i32>} : memref<128x16xf32, #tpu.memory_space<vmem>>, vector<128x16xf32>,
    %c0_i32_14 = arith.constant 0 : i32
    %16 = arith.cmpi eq, %arg1, %c0_i32_14 : i32
    %17 = arith.extui %16 : i1 to i32
    %c0_i32_15 = arith.constant 0 : i32
    %18 = arith.cmpi ne, %17, %c0_i32_15 : i32
    scf.if %18 {
      %c0_16 = arith.constant 0 : index
      %c0_17 = arith.constant 0 : index
      %19 = vector.load %arg8[%c0_16, %c0_17] : memref<128x16xf32, #tpu.memory_space<vmem>>, vector<128x16xf32>
      %c0_18 = arith.constant 0 : index
      %c0_19 = arith.constant 0 : index
      %20 = vector.load %arg6[%c0_18, %c0_19] : memref<1x16xf32, #tpu.memory_space<vmem>>, vector<1x16xf32>
      %21 = vector.broadcast %20 : vector<1x16xf32> to vector<128x16xf32>
      %22 = arith.addf %19, %21 : vector<128x16xf32>
      %c0_20 = arith.constant 0 : index
      %c0_21 = arith.constant 0 : index
      %23 = vector.load %arg7[%c0_20, %c0_21] : memref<128x16xf32, #tpu.memory_space<vmem>>, vector<128x16xf32>
      tpu.vector_store %arg7[%c0_20, %c0_21], %22 {strides = array<i32>} : memref<128x16xf32, #tpu.memory_space<vmem>>, vector<128x16xf32>,
    } else {
    }
    return
  }
  func.func @transform_0(%arg0: i32, %arg1: i32) -> (i32, i32) {
    %c0_i32 = arith.constant 0 : i32
    %c0_i32_0 = arith.constant 0 : i32
    return %arg0, %c0_i32 : i32, i32
  }
  func.func @transform_1(%arg0: i32, %arg1: i32) -> (i32, i32) {
    %c0_i32 = arith.constant 0 : i32
    %c0_i32_0 = arith.constant 0 : i32
    return %c0_i32, %arg1 : i32, i32
  }
  func.func @transform_2(%arg0: i32, %arg1: i32) -> (i32, i32) {
    %c0_i32 = arith.constant 0 : i32
    %c0_i32_0 = arith.constant 0 : i32
    return %c0_i32, %arg1 : i32, i32
  }
  func.func @transform_3(%arg0: i32, %arg1: i32) -> (i32, i32) {
    %c0_i32 = arith.constant 0 : i32
    %c0_i32_0 = arith.constant 0 : i32
    return %arg1, %c0_i32 : i32, i32
  }
  func.func @transform_4(%arg0: i32, %arg1: i32) -> (i32, i32) {
    %c0_i32 = arith.constant 0 : i32
    %c0_i32_0 = arith.constant 0 : i32
    %c0_i32_1 = arith.constant 0 : i32
    return %c0_i32, %c0_i32_0 : i32, i32
  }
  func.func @transform_5(%arg0: i32, %arg1: i32) -> (i32, i32) {
    %c0_i32 = arith.constant 0 : i32
    %c0_i32_0 = arith.constant 0 : i32
    return %arg0, %c0_i32 : i32, i32
  }
}

</mosaic_0001>

<bundles_post_ra>
// kernel: mlp_pallas.1
= control target key start
LH: loop header
LB: loop body
LE: loop exit
PB: predicated region body
PF: predicated region fallthrough
CT: control target
= control target key end

     0   :  { %s1198_s18 = smov 0   ;;  %s1200_s19 = smov 0   ;;  %s1396_s0 = inlined_call_operand.vmem [shape: f32[512,16], index: 0, kind: input, shape index: {}]   ;;  %s1397_s1 = inlined_call_operand.vmem [shape: f32[16,32], index: 1, kind: input, shape index: {}]   ;;  %s1398_s2 = inlined_call_operand.vmem [shape: f32[1,32], index: 2, kind: input, shape index: {}]   ;;  %s1399_s3 = inlined_call_operand.vmem [shape: f32[32,16], index: 3, kind: input, shape index: {}]   ;;  %s1400_s4 = inlined_call_operand.vmem [shape: f32[1,16], index: 4, kind: input, shape index: {}]   ;;  %s1401_s5 = inlined_call_operand.vmem [shape: f32[512,16], index: 5, kind: output, shape index: {}]  }
   0x1   :  { %s1202_s20 = smov 0  }
   0x2 LB: > { %s27_s21 = sadd.s32 1, %s1161_s19  ;;  %p967_p0 = scmp.ge.s32.totalorder %s1165_s20, 1  ;;  %s1165_s20 = sphi %s1202_s20, %s15_s20   ;;  %s1161_s19 = sphi %s1200_s19, %s1403_s19   ;;  %s1157_s18 = sphi %s1198_s18, %s1402_s18  }
   0x3   : > { %p29_p1 = scmp.ge.s32.totalorder %s27_s21, 4  ;;  %p228_p2 = scmp.lt.s32.totalorder %s1165_s20, 5 }
   0x5   : > { %s1405_s21 = smov (%p29_p1, %s27_s21), 0  ;;  %p229_p3 = pnand %p967_p0, %p228_p2 }
   0x6   : > { %v330_v0 = vld [vmem:[%s1397_s1] sm:$0xff] (!%p229_p3)  ;;  %v331_v1 = vld [vmem:[%s1397_s1 + $0x8] sm:$0xff] (!%p229_p3)  ;;  %s968_s26 = sshll.u32 (!%p229_p3), %s1157_s18, 4  ;;  %vm297_vm0 = vcmask (!%p229_p3), 130048   ;;  %v567_v22 = vld [vmem:[%s1399_s3 + $0x10] sm:$0xff] (!%p229_p3)  ;;  %v1167_v25 = vmov (!%p229_p3), 0.0  }
   0x7   : > { %232 = sbr.rel (%p229_p3) target bundleno = 491 (0x1eb), region = 40  ;;  %v565_v2 = vld [vmem:[%s1399_s3] sm:$0xff] (!%p229_p3)  ;;  %v1106_v3 = vpack.c.bf16 (!%p229_p3), %v331_v1, %v330_v0  ;;  %p269_p4 = scmp.lt.s32.totalorder (!%p229_p3), %s968_s26, 63  ;;  %v566_v4 = vld [vmem:[%s1399_s3 + $0x8] sm:$0xff] (!%p229_p3)  ;;  %v568_v23 = vld [vmem:[%s1399_s3 + $0x18] sm:$0xff] (!%p229_p3)  ;;  %299 = vst.msk [vmem:[#allocation2 + $0x8] sm:$0xff] (!%p229_p3), %vm297_vm0, %v1167_v25 }
   0x8   : > { %v1110_v5 = vpack.c.bf16 (!%p229_p3), %v566_v4, %v565_v2  ;;  %v1114_v24 = vpack.c.bf16 (!%p229_p3), %v568_v23, %v567_v22  ;;  %298 = vst.msk [vmem:[#allocation2] sm:$0xff] (!%p229_p3), %vm297_vm0, %v1167_v25  ;;  %300 = vst.msk [vmem:[#allocation2 + $0x10] sm:$0xff] (!%p229_p3), %vm297_vm0, %v1167_v25  ;;  %v972_v26 = vld [vmem:[%s1398_s2] ss:$0 sm:$0xff] (!%p229_p3)  ;;  %vm569_vm1 = vcmask (!%p229_p3), 261120  }
   0x9   : > { %1107 = vmatprep.subr.bf16.mxu0 (!%p229_p3), %v1106_v3  ;;  %301 = vst.msk [vmem:[#allocation2 + $0x18] sm:$0xff] (!%p229_p3), %vm297_vm0, %v1167_v25  ;;  %302 = vst.msk [vmem:[#allocation2 + $0x20] sm:$0xff] (!%p229_p3), %vm297_vm0, %v1167_v25 }
   0xa   : > { %1109 = vmatpush3.bf16.msra.mxu0 (!%p229_p3), %v1106_v3  ;;  %1111 = vmatprep.subr.bf16.mxu1 (!%p229_p3), %v1110_v5  ;;  %303 = vst.msk [vmem:[#allocation2 + $0x28] sm:$0xff] (!%p229_p3), %vm297_vm0, %v1167_v25  ;;  %304 = vst.msk [vmem:[#allocation2 + $0x30] sm:$0xff] (!%p229_p3), %vm297_vm0, %v1167_v25 }
   0xb   : > { %1113 = vmatpush3.bf16.msra.mxu1 (!%p229_p3), %v1110_v5  ;;  %305 = vst.msk [vmem:[#allocation2 + $0x38] sm:$0xff] (!%p229_p3), %vm297_vm0, %v1167_v25  ;;  %306 = vst.msk [vmem:[#allocation2 + $0x40] sm:$0xff] (!%p229_p3), %vm297_vm0, %v1167_v25 }
   0xc   : > { %1115 = vmatprep.subr.bf16.mxu1 (!%p229_p3), %v1114_v24  ;;  %307 = vst.msk [vmem:[#allocation2 + $0x48] sm:$0xff] (!%p229_p3), %vm297_vm0, %v1167_v25  ;;  %308 = vst.msk [vmem:[#allocation2 + $0x50] sm:$0xff] (!%p229_p3), %vm297_vm0, %v1167_v25 }
   0xd   : > { %309 = vst.msk [vmem:[#allocation2 + $0x58] sm:$0xff] (!%p229_p3), %vm297_vm0, %v1167_v25  ;;  %310 = vst.msk [vmem:[#allocation2 + $0x60] sm:$0xff] (!%p229_p3), %vm297_vm0, %v1167_v25 }
   0xe   : > { %s1407_s26 = smov (!%p269_p4, %s968_s26), 63  ;;  %311 = vst.msk [vmem:[#allocation2 + $0x68] sm:$0xff] %vm297_vm0, %v1167_v25  ;;  %312 = vst.msk [vmem:[#allocation2 + $0x70] sm:$0xff] %vm297_vm0, %v1167_v25 }
   0xf   : > { %s969_s6 = sshll.u32 %s1407_s26, 3  ;;  %1117 = vmatpush3.bf16.msra.mxu1 %v1114_v24  ;;  %313 = vst.msk [vmem:[#allocation2 + $0x78] sm:$0xff] %vm297_vm0, %v1167_v25  ;;  %v1317_v25 = vld [vmem:[%s1400_s4] ss:$0 sm:$0xff] }
  0x10   : > { %s1236_s9 = scalar_lea.vmem %s1396_s0, %s969_s6  ;;  %v553_v24 = vld [vmem:[#allocation2 + $0x20] sm:$0xff]  ;;  %s1325_s23 = scalar_lea.vmem %s1401_s5, %s969_s6 }
  0x11   : > { %v314_v6 = vld [vmem:[%s1236_s9] sm:$0xff]  ;;  %v315_v7 = vld [vmem:[%s1236_s9 + $0x8] sm:$0xff]  ;;  %v316_v8 = vld [vmem:[%s1236_s9 + $0x10] sm:$0xff] }
  0x12   : > { %1050 = vmatprep.mubr.msk.f32.mxu0 %vm297_vm0, %v314_v6  ;;  %v317_v9 = vld [vmem:[%s1236_s9 + $0x18] sm:$0xff]  ;;  %v318_v10 = vld [vmem:[%s1236_s9 + $0x20] sm:$0xff]  ;;  %v319_v11 = vld [vmem:[%s1236_s9 + $0x28] sm:$0xff] }
  0x13   : > { %1051 = vmatmul.mubr.msk.f32.vlgmr.msra.gmra.mrb[0].mxu0 %vm297_vm0, %v315_v7  ;;  %v320_v12 = vld [vmem:[%s1236_s9 + $0x30] sm:$0xff]  ;;  %v321_v13 = vld [vmem:[%s1236_s9 + $0x38] sm:$0xff]  ;;  %v322_v14 = vld [vmem:[%s1236_s9 + $0x40] sm:$0xff] }
  0x14   : > { %1053 = vmatprep.mubr.msk.f32.mxu0 %vm297_vm0, %v316_v8  ;;  %v323_v15 = vld [vmem:[%s1236_s9 + $0x48] sm:$0xff]  ;;  %v324_v16 = vld [vmem:[%s1236_s9 + $0x50] sm:$0xff]  ;;  %v325_v17 = vld [vmem:[%s1236_s9 + $0x58] sm:$0xff] }
  0x15   : > { %v326_v18 = vld [vmem:[%s1236_s9 + $0x60] sm:$0xff]  ;;  %v327_v19 = vld [vmem:[%s1236_s9 + $0x68] sm:$0xff]  ;;  %v328_v20 = vld [vmem:[%s1236_s9 + $0x70] sm:$0xff] }
  0x16   : > { %v329_v21 = vld [vmem:[%s1236_s9 + $0x78] sm:$0xff]  ;;  %v554_v23 = vld [vmem:[#allocation2 + $0x28] sm:$0xff] }
  0x17   : > { %1054 = vmatmul.mubr.msk.f32.gmra.mrb[2].mxu0 %vm297_vm0, %v317_v9 }
  0x18   : > { %1056 = vmatprep.mubr.msk.f32.mxu0 %vm297_vm0, %v318_v10 }
  0x1b   : > { %1057 = vmatmul.mubr.msk.f32.gmra.mrb[4].mxu0 %vm297_vm0, %v319_v11  ;;  %v550_v11 = vld [vmem:[#allocation2 + $0x8] sm:$0xff] }
  0x1c   : > { %1059 = vmatprep.mubr.msk.f32.mxu0 %vm297_vm0, %v320_v12  ;;  %v549_v12 = vld [vmem:[#allocation2] sm:$0xff] }
  0x1f   : > { %1060 = vmatmul.mubr.msk.f32.gmra.mrb[6].mxu0 %vm297_vm0, %v321_v13 }
  0x20   : > { %1062 = vmatprep.mubr.msk.f32.mxu0 %vm297_vm0, %v322_v14 }
  0x23   : > { %1063 = vmatmul.mubr.msk.f32.gmra.mrb[8].mxu0 %vm297_vm0, %v323_v15 }
  0x24   : > { %1065 = vmatprep.mubr.msk.f32.mxu0 %vm297_vm0, %v324_v16 }
  0x27   : > { %1066 = vmatmul.mubr.msk.f32.gmra.mrb[10].mxu0 %vm297_vm0, %v325_v17  ;;  %v552_v17 = vld [vmem:[#allocation2 + $0x18] sm:$0xff] }
  0x28   : > { %1068 = vmatprep.mubr.msk.f32.mxu0 %vm297_vm0, %v326_v18  ;;  %v551_v18 = vld [vmem:[#allocation2 + $0x10] sm:$0xff] }
  0x2b   : > { %1069 = vmatmul.mubr.msk.f32.gmra.mrb[12].mxu0 %vm297_vm0, %v327_v19 }
  0x2c   : > { %1071 = vmatprep.mubr.msk.f32.mxu0 %vm297_vm0, %v328_v20 }
  0x2f   : > { %1072 = vmatmul.mubr.msk.f32.gmra.mrb[14].mxu0 %vm297_vm0, %v329_v21 }
  0xe6   : > { %v1052_v27 = vpop.f32.mrb[0].mxu0 }
  0xe7   : > { %v460_v28 = vadd.f32 %v1052_v27, %v972_v26  ;;  %v454_v29 = vpop.f32.mrb[1].mxu0 }
  0xe8   : > { %v455_v30 = vadd.f32 %v972_v26, %v454_v29 }
  0xe9   : > { %v534_v33 = vmax.f32 %v460_v28, 0.0 }
  0xea   : > { %v533_v31 = vmax.f32 %v455_v30, 0.0  ;;  %v1055_v32 = vpop.f32.mrb[2].mxu0 }
  0xeb   : > { %v470_v34 = vadd.f32 %v1055_v32, %v972_v26  ;;  %v464_v35 = vpop.f32.mrb[3].mxu0 }
  0xec   : > { %v465_v36 = vadd.f32 %v972_v26, %v464_v35  ;;  %1082 = vmatprep.mubr.msk.f32.mxu1 %vm569_vm1, %v533_v31  ;;  %v556_v31 = vld [vmem:[#allocation2 + $0x38] sm:$0xff] }
  0xed   : > { %1083 = vmatmul.mubr.msk.f32.vlgmr.msra.gmra.mrb[0].mxu1 %vm569_vm1, %v534_v33  ;;  %v536_v39 = vmax.f32 %v470_v34, 0.0  ;;  %v555_v34 = vld [vmem:[#allocation2 + $0x30] sm:$0xff] }
  0xee   : > { %v535_v37 = vmax.f32 %v465_v36, 0.0  ;;  %v1058_v38 = vpop.f32.mrb[4].mxu0 }
  0xef   : > { %v480_v40 = vadd.f32 %v1058_v38, %v972_v26  ;;  %v474_v41 = vpop.f32.mrb[5].mxu0 }
  0xf0   : > { %v475_v42 = vadd.f32 %v972_v26, %v474_v41  ;;  %1085 = vmatprep.mubr.msk.f32.mxu1 %vm569_vm1, %v535_v37  ;;  %v558_v41 = vld [vmem:[#allocation2 + $0x48] sm:$0xff] }
  0xf1   : > { %1086 = vmatmul.mubr.msk.f32.gmra.mrb[2].mxu1 %vm569_vm1, %v536_v39  ;;  %v538_v45 = vmax.f32 %v480_v40, 0.0 }
  0xf2   : > { %v537_v43 = vmax.f32 %v475_v42, 0.0  ;;  %v1061_v44 = vpop.f32.mrb[6].mxu0 }
  0xf3   : > { %v490_v46 = vadd.f32 %v1061_v44, %v972_v26  ;;  %v484_v47 = vpop.f32.mrb[7].mxu0  ;;  %v557_v44 = vld [vmem:[#allocation2 + $0x40] sm:$0xff] }
  0xf4   : > { %v485_v48 = vadd.f32 %v972_v26, %v484_v47  ;;  %1088 = vmatprep.mubr.msk.f32.mxu1 %vm569_vm1, %v537_v43 }
  0xf5   : > { %1089 = vmatmul.mubr.msk.f32.gmra.mrb[4].mxu1 %vm569_vm1, %v538_v45  ;;  %v540_v51 = vmax.f32 %v490_v46, 0.0 }
  0xf6   : > { %v539_v49 = vmax.f32 %v485_v48, 0.0  ;;  %v1064_v50 = vpop.f32.mrb[8].mxu0 }
  0xf7   : > { %v500_v52 = vadd.f32 %v1064_v50, %v972_v26  ;;  %v494_v53 = vpop.f32.mrb[9].mxu0 }
  0xf8   : > { %v495_v54 = vadd.f32 %v972_v26, %v494_v53  ;;  %1091 = vmatprep.mubr.msk.f32.mxu1 %vm569_vm1, %v539_v49 }
  0xf9   : > { %1092 = vmatmul.mubr.msk.f32.gmra.mrb[6].mxu1 %vm569_vm1, %v540_v51  ;;  %v542_v57 = vmax.f32 %v500_v52, 0.0  ;;  %v560_v51 = vld [vmem:[#allocation2 + $0x58] sm:$0xff] }
  0xfa   : > { %v541_v55 = vmax.f32 %v495_v54, 0.0  ;;  %v1067_v56 = vpop.f32.mrb[10].mxu0  ;;  %v559_v54 = vld [vmem:[#allocation2 + $0x50] sm:$0xff] }
  0xfb   : > { %v510_v58 = vadd.f32 %v1067_v56, %v972_v26  ;;  %v504_v59 = vpop.f32.mrb[11].mxu0 }
  0xfc   : > { %v505_v60 = vadd.f32 %v972_v26, %v504_v59  ;;  %1094 = vmatprep.mubr.msk.f32.mxu1 %vm569_vm1, %v541_v55 }
  0xfd   : > { %1095 = vmatmul.mubr.msk.f32.gmra.mrb[8].mxu1 %vm569_vm1, %v542_v57  ;;  %v544_v63 = vmax.f32 %v510_v58, 0.0 }
  0xfe   : > { %v543_v61 = vmax.f32 %v505_v60, 0.0  ;;  %v1070_v62 = vpop.f32.mrb[12].mxu0 }
  0xff   : > { %v520_v0 = vadd.f32 %v1070_v62, %v972_v26  ;;  %v514_v1 = vpop.f32.mrb[13].mxu0 }
 0x100   : > { %v515_v2 = vadd.f32 %v972_v26, %v514_v1  ;;  %1097 = vmatprep.mubr.msk.f32.mxu1 %vm569_vm1, %v543_v61  ;;  %v562_v61 = vld [vmem:[#allocation2 + $0x68] sm:$0xff] }
 0x101   : > { %1098 = vmatmul.mubr.msk.f32.gmra.mrb[10].mxu1 %vm569_vm1, %v544_v63  ;;  %v546_v5 = vmax.f32 %v520_v0, 0.0  ;;  %v561_v0 = vld [vmem:[#allocation2 + $0x60] sm:$0xff] }
 0x102   : > { %v545_v3 = vmax.f32 %v515_v2, 0.0  ;;  %v1073_v4 = vpop.f32.mrb[14].mxu0 }
 0x103   : > { %v530_v6 = vadd.f32 %v1073_v4, %v972_v26  ;;  %v524_v7 = vpop.f32.mrb[15].mxu0 }
 0x104   : > { %v525_v8 = vadd.f32 %v972_v26, %v524_v7  ;;  %1100 = vmatprep.mubr.msk.f32.mxu1 %vm569_vm1, %v545_v3  ;;  %v564_v7 = vld [vmem:[#allocation2 + $0x78] sm:$0xff] }
 0x105   : > { %1101 = vmatmul.mubr.msk.f32.gmra.mrb[12].mxu1 %vm569_vm1, %v546_v5  ;;  %v548_v10 = vmax.f32 %v530_v6, 0.0 }
 0x106   : > { %v547_v9 = vmax.f32 %v525_v8, 0.0 }
 0x108   : > { %1103 = vmatprep.mubr.msk.f32.mxu1 %vm569_vm1, %v547_v9 }
 0x109   : > { %1104 = vmatmul.mubr.msk.f32.gmra.mrb[14].mxu1 %vm569_vm1, %v548_v10  ;;  %v563_v10 = vld [vmem:[#allocation2 + $0x70] sm:$0xff] }
 0x1c0   : > { %v1084_v13 = vpop.f32.mrb[0].mxu1 }
 0x1c1   : > { %v764_v14 = vadd.f32 %v1084_v13, %v550_v11  ;;  %v684_v15 = vpop.f32.mrb[1].mxu1 }
 0x1c2   : > { %v763_v16 = vadd.f32 %v684_v15, %v549_v12 }
 0x1c3   : > { %780 = vst.msk [vmem:[#allocation2 + $0x8] sm:$0xff] %vm297_vm0, %v764_v14 }
 0x1c4   : > { %779 = vst.msk [vmem:[#allocation2] sm:$0xff] %vm297_vm0, %v763_v16  ;;  %v1087_v19 = vpop.f32.mrb[2].mxu1 }
 0x1c5   : > { %v766_v20 = vadd.f32 %v1087_v19, %v552_v17  ;;  %v694_v21 = vpop.f32.mrb[3].mxu1 }
 0x1c6   : > { %v765_v22 = vadd.f32 %v694_v21, %v551_v18 }
 0x1c7   : > { %782 = vst.msk [vmem:[#allocation2 + $0x18] sm:$0xff] %vm297_vm0, %v766_v20 }
 0x1c8   : > { %781 = vst.msk [vmem:[#allocation2 + $0x10] sm:$0xff] %vm297_vm0, %v765_v22  ;;  %v1090_v26 = vpop.f32.mrb[4].mxu1 }
 0x1c9   : > { %v768_v27 = vadd.f32 %v1090_v26, %v554_v23  ;;  %v704_v28 = vpop.f32.mrb[5].mxu1 }
 0x1ca   : > { %v799_v29 = vld [vmem:[#allocation2 + $0x8] sm:$0xff]  ;;  %v767_v30 = vadd.f32 %v704_v28, %v553_v24 }
 0x1cb   : > { %v822_v32 = vadd.f32 %v1317_v25, %v799_v29  ;;  %v798_v33 = vld [vmem:[#allocation2] sm:$0xff]  ;;  %784 = vst.msk [vmem:[#allocation2 + $0x28] sm:$0xff] %vm297_vm0, %v768_v27 }
 0x1cc   : > { %v821_v35 = vadd.f32 %v1317_v25, %v798_v33  ;;  %783 = vst.msk [vmem:[#allocation2 + $0x20] sm:$0xff] %vm297_vm0, %v767_v30  ;;  %v1093_v36 = vpop.f32.mrb[6].mxu1 }
 0x1cd   : > { %838 = vst.msk [vmem:[%s1325_s23 + $0x8] sm:$0xff] %vm297_vm0, %v822_v32  ;;  %v770_v37 = vadd.f32 %v1093_v36, %v556_v31  ;;  %v714_v38 = vpop.f32.mrb[7].mxu1 }
 0x1ce   : > { %837 = vst.msk [vmem:[%s1325_s23] sm:$0xff] %vm297_vm0, %v821_v35  ;;  %v801_v39 = vld [vmem:[#allocation2 + $0x18] sm:$0xff]  ;;  %v769_v40 = vadd.f32 %v714_v38, %v555_v34 }
 0x1cf   : > { %v824_v42 = vadd.f32 %v1317_v25, %v801_v39  ;;  %v800_v43 = vld [vmem:[#allocation2 + $0x10] sm:$0xff]  ;;  %786 = vst.msk [vmem:[#allocation2 + $0x38] sm:$0xff] %vm297_vm0, %v770_v37 }
 0x1d0   : > { %v823_v45 = vadd.f32 %v1317_v25, %v800_v43  ;;  %785 = vst.msk [vmem:[#allocation2 + $0x30] sm:$0xff] %vm297_vm0, %v769_v40  ;;  %v1096_v46 = vpop.f32.mrb[8].mxu1 }
 0x1d1   : > { %840 = vst.msk [vmem:[%s1325_s23 + $0x18] sm:$0xff] %vm297_vm0, %v824_v42  ;;  %v772_v47 = vadd.f32 %v1096_v46, %v558_v41  ;;  %v724_v48 = vpop.f32.mrb[9].mxu1 }
 0x1d2   : > { %839 = vst.msk [vmem:[%s1325_s23 + $0x10] sm:$0xff] %vm297_vm0, %v823_v45  ;;  %v803_v49 = vld [vmem:[#allocation2 + $0x28] sm:$0xff]  ;;  %v771_v50 = vadd.f32 %v724_v48, %v557_v44 }
 0x1d3   : > { %v826_v52 = vadd.f32 %v1317_v25, %v803_v49  ;;  %v802_v53 = vld [vmem:[#allocation2 + $0x20] sm:$0xff]  ;;  %788 = vst.msk [vmem:[#allocation2 + $0x48] sm:$0xff] %vm297_vm0, %v772_v47 }
 0x1d4   : > { %v825_v55 = vadd.f32 %v1317_v25, %v802_v53  ;;  %787 = vst.msk [vmem:[#allocation2 + $0x40] sm:$0xff] %vm297_vm0, %v771_v50  ;;  %v1099_v56 = vpop.f32.mrb[10].mxu1 }
 0x1d5   : > { %842 = vst.msk [vmem:[%s1325_s23 + $0x28] sm:$0xff] %vm297_vm0, %v826_v52  ;;  %v774_v57 = vadd.f32 %v1099_v56, %v560_v51  ;;  %v734_v58 = vpop.f32.mrb[11].mxu1 }
 0x1d6   : > { %841 = vst.msk [vmem:[%s1325_s23 + $0x20] sm:$0xff] %vm297_vm0, %v825_v55  ;;  %v805_v59 = vld [vmem:[#allocation2 + $0x38] sm:$0xff]  ;;  %v773_v60 = vadd.f32 %v734_v58, %v559_v54 }
 0x1d7   : > { %v828_v62 = vadd.f32 %v1317_v25, %v805_v59  ;;  %v804_v63 = vld [vmem:[#allocation2 + $0x30] sm:$0xff]  ;;  %790 = vst.msk [vmem:[#allocation2 + $0x58] sm:$0xff] %vm297_vm0, %v774_v57 }
 0x1d8   : > { %v827_v1 = vadd.f32 %v1317_v25, %v804_v63  ;;  %789 = vst.msk [vmem:[#allocation2 + $0x50] sm:$0xff] %vm297_vm0, %v773_v60  ;;  %v1102_v2 = vpop.f32.mrb[12].mxu1 }
 0x1d9   : > { %844 = vst.msk [vmem:[%s1325_s23 + $0x38] sm:$0xff] %vm297_vm0, %v828_v62  ;;  %v776_v3 = vadd.f32 %v1102_v2, %v562_v61  ;;  %v744_v4 = vpop.f32.mrb[13].mxu1 }
 0x1da   : > { %843 = vst.msk [vmem:[%s1325_s23 + $0x30] sm:$0xff] %vm297_vm0, %v827_v1  ;;  %v807_v5 = vld [vmem:[#allocation2 + $0x48] sm:$0xff]  ;;  %v775_v6 = vadd.f32 %v744_v4, %v561_v0 }
 0x1db   : > { %v830_v8 = vadd.f32 %v1317_v25, %v807_v5  ;;  %v806_v9 = vld [vmem:[#allocation2 + $0x40] sm:$0xff]  ;;  %792 = vst.msk [vmem:[#allocation2 + $0x68] sm:$0xff] %vm297_vm0, %v776_v3 }
 0x1dc   : > { %v829_v11 = vadd.f32 %v1317_v25, %v806_v9  ;;  %791 = vst.msk [vmem:[#allocation2 + $0x60] sm:$0xff] %vm297_vm0, %v775_v6  ;;  %v1105_v12 = vpop.f32.mrb[14].mxu1 }
 0x1dd   : > { %846 = vst.msk [vmem:[%s1325_s23 + $0x48] sm:$0xff] %vm297_vm0, %v830_v8  ;;  %v778_v13 = vadd.f32 %v1105_v12, %v564_v7  ;;  %v754_v14 = vpop.f32.mrb[15].mxu1 }
 0x1de   : > { %845 = vst.msk [vmem:[%s1325_s23 + $0x40] sm:$0xff] %vm297_vm0, %v829_v11  ;;  %v809_v15 = vld [vmem:[#allocation2 + $0x58] sm:$0xff]  ;;  %v777_v16 = vadd.f32 %v754_v14, %v563_v10 }
 0x1df   : > { %v832_v17 = vadd.f32 %v1317_v25, %v809_v15  ;;  %v808_v18 = vld [vmem:[#allocation2 + $0x50] sm:$0xff]  ;;  %794 = vst.msk [vmem:[#allocation2 + $0x78] sm:$0xff] %vm297_vm0, %v778_v13 }
 0x1e0   : > { %v831_v19 = vadd.f32 %v1317_v25, %v808_v18  ;;  %793 = vst.msk [vmem:[#allocation2 + $0x70] sm:$0xff] %vm297_vm0, %v777_v16 }
 0x1e1   : > { %848 = vst.msk [vmem:[%s1325_s23 + $0x58] sm:$0xff] %vm297_vm0, %v832_v17 }
 0x1e2   : > { %847 = vst.msk [vmem:[%s1325_s23 + $0x50] sm:$0xff] %vm297_vm0, %v831_v19  ;;  %v811_v20 = vld [vmem:[#allocation2 + $0x68] sm:$0xff] }
 0x1e3   : > { %v834_v21 = vadd.f32 %v1317_v25, %v811_v20  ;;  %v810_v22 = vld [vmem:[#allocation2 + $0x60] sm:$0xff] }
 0x1e4   : > { %v833_v23 = vadd.f32 %v1317_v25, %v810_v22 }
 0x1e5   : > { %850 = vst.msk [vmem:[%s1325_s23 + $0x68] sm:$0xff] %vm297_vm0, %v834_v21 }
 0x1e6   : > { %849 = vst.msk [vmem:[%s1325_s23 + $0x60] sm:$0xff] %vm297_vm0, %v833_v23  ;;  %v813_v24 = vld [vmem:[#allocation2 + $0x78] sm:$0xff] }
 0x1e7   : > { %v836_v26 = vadd.f32 %v1317_v25, %v813_v24  ;;  %v812_v27 = vld [vmem:[#allocation2 + $0x70] sm:$0xff] }
 0x1e8   : > { %v835_v28 = vadd.f32 %v1317_v25, %v812_v27 }
 0x1e9   : > { %852 = vst.msk [vmem:[%s1325_s23 + $0x78] sm:$0xff] %vm297_vm0, %v836_v26 }
 0x1ea   : > { %851 = vst.msk [vmem:[%s1325_s23 + $0x70] sm:$0xff] %vm297_vm0, %v835_v28 }
 0x1eb PF: > { %s15_s20 = sadd.s32 1, %s1165_s20   ;;  %s1402_s18 = smov %s1161_s19 }
 0x1ec   : > { %p12_p5 = scmp.ge.s32.totalorder %s15_s20, 6   ;;  %s1403_s19 = smov %s1405_s21 }
 0x1ee   :  { %14 = sbr.rel (!%p12_p5) target bundleno = 2 (0x2), region = 87 }

</bundles_post_ra>
